<compile_context>
chip_gen: v7x
topology: tpu7x:2x2x1
jax: 0.10.0
libtpu: 0.0.40
codegen_flags: <defaults>
</compile_context>

<pallas_src>
import functools
import math

import jax
import jax.numpy as jnp
from jax.experimental import pallas as pl
from jax.experimental.pallas import tpu as pltpu


def _gcn_kernel(adj_ref, x_ref, w_ref, o_ref, acc_ref, *, n_cols, tk):
    """One (row-panel i, K-tile k) step of out = relu((adj @ x) @ W)."""
    k = pl.program_id(1)

    @pl.when(k == 0)
    def _():
        acc_ref[...] = jnp.zeros_like(acc_ref)

    a = adj_ref[...]
    if n_cols % tk != 0:
        # Last K tile reads past the adjacency's column extent; those lanes
        # hold unspecified values, so zero them before accumulating.
        col = k * tk + jax.lax.broadcasted_iota(jnp.int32, a.shape, 1)
        a = jnp.where(col < n_cols, a, jnp.zeros_like(a))

    # Row panel of (adj @ x), accumulated over K tiles in f32 on the MXU.
    acc_ref[...] += jnp.dot(a, x_ref[...], preferred_element_type=jnp.float32)

    # Finalize this row panel: project through W, fuse ReLU, f32 store.
    @pl.when(k == pl.num_programs(1) - 1)
    def _():
        h = acc_ref[...].astype(w_ref.dtype)
        out = jnp.dot(h, w_ref[...], preferred_element_type=jnp.float32)
        o_ref[...] = jnp.maximum(out, 0.0).astype(o_ref.dtype)


def _default_block_rows():
    """Per-generation row-panel default: 128 on v5e (4x128^2 MXU), else 256."""
    try:
        kind = jax.devices()[0].device_kind.lower()
    except Exception:
        return 256
    return 128 if "v5" in kind else 256


def graph_convolution_forward(
    x,
    adj_dense,
    weight,
    *,
    block_rows=None,
    block_k=512,
    compute_dtype=jnp.bfloat16,
):
    """GraphConvolution.forward: relu(adj @ (x @ W)). Dropout p=0 -> identity.

    Computed as relu((adj @ x) @ W) (exact reassociation) so that output row
    panels are independent and the grid's row axis can be "parallel".
    """
    N, F_in = x.shape
    F_in2, F_out = weight.shape
    assert F_in == F_in2
    assert adj_dense.shape == (N, N)

    if block_rows is None:
        block_rows = _default_block_rows()

    # Tile sizes: when clamped to the full extent the (8,128) divisibility
    # rule is satisfied via the "equals the full dim" clause; otherwise the
    # defaults (multiples of 8 / 128) satisfy it directly.
    tm = min(block_rows, N)
    tk = min(block_k, N)

    # Feed the MXU operands in bf16 (no-op casts if the caller already stores
    # them bf16). adj is the dominant HBM stream -> halves kernel traffic.
    adj_c = adj_dense.astype(compute_dtype)
    x_c = x.astype(compute_dtype)
    w_c = weight.astype(compute_dtype)

    kernel = functools.partial(_gcn_kernel, n_cols=N, tk=tk)
    out = pl.pallas_call(
        kernel,
        out_shape=jax.ShapeDtypeStruct((N, F_out), jnp.float32),
        grid_spec=pltpu.PrefetchScalarGridSpec(
            num_scalar_prefetch=0,
            grid=(pl.cdiv(N, tm), pl.cdiv(N, tk)),
            in_specs=[
                pl.BlockSpec((tm, tk), lambda i, k: (i, k)),       # adj tile
                pl.BlockSpec((tk, F_in), lambda i, k: (k, 0)),     # x K-slice
                pl.BlockSpec((F_in, F_out), lambda i, k: (0, 0)),  # W resident
            ],
            out_specs=pl.BlockSpec((tm, F_out), lambda i, k: (i, 0)),
            # Per-row-panel f32 accumulator for (adj @ x); bounded by tiles.
            scratch_shapes=[pltpu.VMEM((tm, F_in), jnp.float32)],
        ),
        compiler_params=pltpu.CompilerParams(
            # Row panels are independent -> shardable across TensorCores.
            # K is a reduction with init/finalize -> must stay sequential.
            dimension_semantics=("parallel", "arbitrary"),
            # Above v5e's 16 MiB scoped default, below v7x's 64 MiB physical.
            vmem_limit_bytes=48 * 1024 * 1024,
        ),
    )(adj_c, x_c, w_c)
    return out


def weight_variable_glorot(key, input_dim, output_dim):
    """Glorot-uniform init, matching the torch helper's shape [in, out]."""
    init_range = math.sqrt(6.0 / (input_dim + output_dim))
    return jax.random.uniform(
        key, (input_dim, output_dim), dtype=jnp.float32,
        minval=-init_range, maxval=init_range,
    )


def make_normalized_adj(key, n):
    """Deterministic symmetric normalized adjacency D^-1/2 (A+I) D^-1/2 (dense)."""
    a = (jax.random.uniform(key, (n, n)) < 0.05).astype(jnp.float32)
    a = jnp.maximum(a, a.T)                       # undirected
    a = a + jnp.eye(n, dtype=jnp.float32)         # self loops
    d = jnp.sum(a, axis=1)
    d_inv_sqrt = 1.0 / jnp.sqrt(d)
    return a * d_inv_sqrt[:, None] * d_inv_sqrt[None, :]


if __name__ == "__main__":
    N = 128          # number of graph nodes
    INPUT_DIM = 64
    OUTPUT_DIM = 128

    key = jax.random.PRNGKey(0)
    kx, kw, ka = jax.random.split(key, 3)

    x = jax.random.normal(kx, (N, INPUT_DIM), dtype=jnp.float32)
    weight = weight_variable_glorot(kw, INPUT_DIM, OUTPUT_DIM)
    adj = make_normalized_adj(ka, N)

    fwd = jax.jit(graph_convolution_forward)
    out = fwd(x, adj, weight)
    out = jax.block_until_ready(out)

    # Reference in plain JAX, mirroring the kernel's bf16-operand / f32-
    # accumulate precision and the (adj @ x) @ W association.
    bf16 = jnp.bfloat16
    ax = jnp.dot(adj.astype(bf16), x.astype(bf16),
                 preferred_element_type=jnp.float32)
    ref = jnp.maximum(
        jnp.dot(ax.astype(bf16), weight.astype(bf16),
                preferred_element_type=jnp.float32),
        0.0,
    )

    assert out.shape == (N, OUTPUT_DIM)
    assert out.dtype == jnp.float32
    assert jnp.allclose(out, ref, atol=2e-3, rtol=2e-3)

    print("KERNEL_OK")
</pallas_src>

<mosaic_0001>
module attributes {stable_mosaic.version = 11 : i64} {
  func.func @_gcn_kernel(%arg0: i32, %arg1: i32, %arg2: memref<128x128xbf16, #tpu.memory_space<vmem>>, %arg3: memref<128x64xbf16, #tpu.memory_space<vmem>>, %arg4: memref<64x128xbf16, #tpu.memory_space<vmem>>, %arg5: memref<128x128xf32, #tpu.memory_space<vmem>>, %arg6: memref<128x64xf32, #tpu.memory_space<vmem>>) attributes {dimension_semantics = [#tpu.dimension_semantics<parallel>, #tpu.dimension_semantics<arbitrary>], iteration_bounds = array<i64: 1, 1>, scalar_prefetch = 0 : i64, scratch_operands = 1 : i64, tpu.core_type = #tpu.core_type<tc>, window_params = [{transform_indices = @transform_0, window_bounds = array<i64: 128, 128>}, {transform_indices = @transform_1, window_bounds = array<i64: 128, 64>}, {pipeline_mode = #tpu.pipeline_mode<synchronous>, transform_indices = @transform_2, window_bounds = array<i64: 64, 128>}, {transform_indices = @transform_3, window_bounds = array<i64: 128, 128>}]} {
    %c0_i32 = arith.constant 0 : i32
    %0 = arith.cmpi eq, %arg1, %c0_i32 : i32
    %1 = arith.extui %0 : i1 to i32
    %c0_i32_0 = arith.constant 0 : i32
    %2 = arith.cmpi ne, %1, %c0_i32_0 : i32
    scf.if %2 {
      %cst_10 = arith.constant 0.000000e+00 : f32
      %12 = vector.broadcast %cst_10 : f32 to vector<128x64xf32>
      %c0_11 = arith.constant 0 : index
      %c0_12 = arith.constant 0 : index
      %13 = vector.load %arg6[%c0_11, %c0_12] : memref<128x64xf32, #tpu.memory_space<vmem>>, vector<128x64xf32>
      tpu.vector_store %arg6[%c0_11, %c0_12], %12 {strides = array<i32>} : memref<128x64xf32, #tpu.memory_space<vmem>>, vector<128x64xf32>,
    } else {
    }
    %c0 = arith.constant 0 : index
    %c0_1 = arith.constant 0 : index
    %3 = vector.load %arg2[%c0, %c0_1] : memref<128x128xbf16, #tpu.memory_space<vmem>>, vector<128x128xbf16>
    %c0_2 = arith.constant 0 : index
    %c0_3 = arith.constant 0 : index
    %4 = vector.load %arg6[%c0_2, %c0_3] : memref<128x64xf32, #tpu.memory_space<vmem>>, vector<128x64xf32>
    %c0_4 = arith.constant 0 : index
    %c0_5 = arith.constant 0 : index
    %5 = vector.load %arg3[%c0_4, %c0_5] : memref<128x64xbf16, #tpu.memory_space<vmem>>, vector<128x64xbf16>
    %cst = arith.constant dense<0.000000e+00> : vector<128x64xf32>
    %6 = tpu.matmul %3, %5, %cst {dimension_numbers = #tpu.dot_dimension_numbers<[1], [0], [0], [1], [0, 0, 1, 1], [], []>} : vector<128x128xbf16>, vector<128x64xbf16>, vector<128x64xf32> -> vector<128x64xf32>
    %7 = arith.addf %4, %6 : vector<128x64xf32>
    %c0_6 = arith.constant 0 : index
    %c0_7 = arith.constant 0 : index
    %8 = vector.load %arg6[%c0_6, %c0_7] : memref<128x64xf32, #tpu.memory_space<vmem>>, vector<128x64xf32>
    tpu.vector_store %arg6[%c0_6, %c0_7], %7 {strides = array<i32>} : memref<128x64xf32, #tpu.memory_space<vmem>>, vector<128x64xf32>,
    %c0_i32_8 = arith.constant 0 : i32
    %9 = arith.cmpi eq, %arg1, %c0_i32_8 : i32
    %10 = arith.extui %9 : i1 to i32
    %c0_i32_9 = arith.constant 0 : i32
    %11 = arith.cmpi ne, %10, %c0_i32_9 : i32
    scf.if %11 {
      %c0_10 = arith.constant 0 : index
      %c0_11 = arith.constant 0 : index
      %12 = vector.load %arg6[%c0_10, %c0_11] : memref<128x64xf32, #tpu.memory_space<vmem>>, vector<128x64xf32>
      %13 = arith.truncf %12 : vector<128x64xf32> to vector<128x64xbf16>
      %c0_12 = arith.constant 0 : index
      %c0_13 = arith.constant 0 : index
      %14 = vector.load %arg4[%c0_12, %c0_13] : memref<64x128xbf16, #tpu.memory_space<vmem>>, vector<64x128xbf16>
      %cst_14 = arith.constant dense<0.000000e+00> : vector<128x128xf32>
      %15 = tpu.matmul %13, %14, %cst_14 {dimension_numbers = #tpu.dot_dimension_numbers<[1], [0], [0], [1], [0, 0, 1, 1], [], []>} : vector<128x64xbf16>, vector<64x128xbf16>, vector<128x128xf32> -> vector<128x128xf32>
      %cst_15 = arith.constant 0.000000e+00 : f32
      %16 = vector.broadcast %cst_15 : f32 to vector<128x128xf32>
      %17 = arith.maximumf %15, %16 : vector<128x128xf32>
      %c0_16 = arith.constant 0 : index
      %c0_17 = arith.constant 0 : index
      %18 = vector.load %arg5[%c0_16, %c0_17] : memref<128x128xf32, #tpu.memory_space<vmem>>, vector<128x128xf32>
      tpu.vector_store %arg5[%c0_16, %c0_17], %17 {strides = array<i32>} : memref<128x128xf32, #tpu.memory_space<vmem>>, vector<128x128xf32>,
    } else {
    }
    return
  }
  func.func @transform_0(%arg0: i32, %arg1: i32) -> (i32, i32) {
    %c0_i32 = arith.constant 0 : i32
    return %arg0, %arg1 : i32, i32
  }
  func.func @transform_1(%arg0: i32, %arg1: i32) -> (i32, i32) {
    %c0_i32 = arith.constant 0 : i32
    %c0_i32_0 = arith.constant 0 : i32
    return %arg1, %c0_i32 : i32, i32
  }
  func.func @transform_2(%arg0: i32, %arg1: i32) -> (i32, i32) {
    %c0_i32 = arith.constant 0 : i32
    %c0_i32_0 = arith.constant 0 : i32
    %c0_i32_1 = arith.constant 0 : i32
    return %c0_i32, %c0_i32_0 : i32, i32
  }
  func.func @transform_3(%arg0: i32, %arg1: i32) -> (i32, i32) {
    %c0_i32 = arith.constant 0 : i32
    %c0_i32_0 = arith.constant 0 : i32
    return %arg0, %c0_i32 : i32, i32
  }
}

</mosaic_0001>

<bundles_post_ra>
// kernel: graph_convolution_forward.1
= control target key start
LH: loop header
LB: loop body
LE: loop exit
PB: predicated region body
PF: predicated region fallthrough
CT: control target
= control target key end

     0   :  { %vm20_vm0 = vcmask 523264   ;;  %v699_v2 = vmov 0.0   ;;  %s835_s0 = inlined_call_operand.vmem [shape: bf16[128,128], index: 0, kind: input, shape index: {}]   ;;  %s836_s1 = inlined_call_operand.vmem [shape: bf16[128,64], index: 1, kind: input, shape index: {}]   ;;  %s837_s2 = inlined_call_operand.vmem [shape: bf16[64,128], index: 2, kind: input, shape index: {}]   ;;  %s838_s3 = inlined_call_operand.hbm [shape: f32[128,128], index: 3, kind: output, shape index: {}]  }
   0x1   :  { %v655_v0 = vld [vmem:[%s836_s1] sm:$0xff]   ;;  %v656_v1 = vld [vmem:[%s836_s1 + $0x8] sm:$0xff]   ;;  %23 = vst.msk [vmem:[#allocation2 + $0x10] sm:$0xff] %vm20_vm0, %v699_v2  ;;  %21 = vst.msk [vmem:[#allocation2] sm:$0xff] %vm20_vm0, %v699_v2 }
   0x2   :  { %595 = vmatprep.subr.bf16.mxu0 %v655_v0  ;;  %22 = vst.msk [vmem:[#allocation2 + $0x8] sm:$0xff] %vm20_vm0, %v699_v2  ;;  %24 = vst.msk [vmem:[#allocation2 + $0x18] sm:$0xff] %vm20_vm0, %v699_v2  ;;  %v657_v3 = vld [vmem:[%s836_s1 + $0x10] sm:$0xff]   ;;  %v658_v4 = vld [vmem:[%s836_s1 + $0x18] sm:$0xff]  }
   0x3   :  { %25 = vst.msk [vmem:[#allocation2 + $0x20] sm:$0xff] %vm20_vm0, %v699_v2  ;;  %26 = vst.msk [vmem:[#allocation2 + $0x28] sm:$0xff] %vm20_vm0, %v699_v2  ;;  %596 = vmatpush3.bf16.msra.mxu0 %v655_v0  ;;  %v663_v5 = vld [vmem:[%s835_s0] sm:$0xff]   ;;  %v660_v7 = vld [vmem:[%s836_s1 + $0x28] sm:$0xff]  }
   0x4   :  { %27 = vst.msk [vmem:[#allocation2 + $0x30] sm:$0xff] %vm20_vm0, %v699_v2  ;;  %28 = vst.msk [vmem:[#allocation2 + $0x38] sm:$0xff] %vm20_vm0, %v699_v2  ;;  %597 = vmatprep.subr.bf16.mxu0 %v656_v1  ;;  %611 = vmatprep.mubr.bf16.mxu0 %v663_v5  ;;  %v659_v6 = vld [vmem:[%s836_s1 + $0x20] sm:$0xff]  }
   0x5   :  { %29 = vst.msk [vmem:[#allocation2 + $0x40] sm:$0xff] %vm20_vm0, %v699_v2  ;;  %30 = vst.msk [vmem:[#allocation2 + $0x48] sm:$0xff] %vm20_vm0, %v699_v2 }
   0x6   :  { %31 = vst.msk [vmem:[#allocation2 + $0x50] sm:$0xff] %vm20_vm0, %v699_v2  ;;  %32 = vst.msk [vmem:[#allocation2 + $0x58] sm:$0xff] %vm20_vm0, %v699_v2 }
   0x7   :  { %33 = vst.msk [vmem:[#allocation2 + $0x60] sm:$0xff] %vm20_vm0, %v699_v2  ;;  %34 = vst.msk [vmem:[#allocation2 + $0x68] sm:$0xff] %vm20_vm0, %v699_v2  ;;  %598 = vmatpush3.bf16.msra.mxu0 %v656_v1 }
   0x8   :  { %35 = vst.msk [vmem:[#allocation2 + $0x70] sm:$0xff] %vm20_vm0, %v699_v2  ;;  %36 = vst.msk [vmem:[#allocation2 + $0x78] sm:$0xff] %vm20_vm0, %v699_v2  ;;  %599 = vmatprep.subr.bf16.mxu0 %v657_v3 }
   0xb   :  { %600 = vmatpush3.bf16.msra.mxu0 %v657_v3 }
   0xc   :  { %601 = vmatprep.subr.bf16.mxu0 %v658_v4 }
   0xf   :  { %602 = vmatpush3.bf16.msra.mxu0 %v658_v4 }
  0x10   :  { %603 = vmatprep.subr.bf16.mxu0 %v659_v6 }
  0x13   :  { %604 = vmatpush3.bf16.msra.mxu0 %v659_v6 }
  0x14   :  { %8 = vsyncpa [#allocation4], 0  ;;  %605 = vmatprep.subr.bf16.mxu0 %v660_v7  ;;  %v661_v8 = vld [vmem:[%s836_s1 + $0x30] sm:$0xff]   ;;  %v662_v9 = vld [vmem:[%s836_s1 + $0x38] sm:$0xff]  }
  0x15   :  { %v664_v10 = vld [vmem:[%s835_s0 + $0x8] sm:$0xff]   ;;  %v665_v11 = vld [vmem:[%s835_s0 + $0x10] sm:$0xff]   ;;  %v666_v12 = vld [vmem:[%s835_s0 + $0x18] sm:$0xff]  }
  0x16   :  { %v667_v13 = vld [vmem:[%s835_s0 + $0x20] sm:$0xff]   ;;  %v668_v14 = vld [vmem:[%s835_s0 + $0x28] sm:$0xff]   ;;  %v669_v15 = vld [vmem:[%s835_s0 + $0x30] sm:$0xff]  }
  0x17   :  { %606 = vmatpush3.bf16.msra.mxu0 %v660_v7  ;;  %v670_v16 = vld [vmem:[%s835_s0 + $0x38] sm:$0xff]   ;;  %v671_v17 = vld [vmem:[%s837_s2] sm:$0xff]   ;;  %v672_v18 = vld [vmem:[%s837_s2 + $0x8] sm:$0xff]  }
  0x18   :  { %607 = vmatprep.subr.bf16.mxu0 %v661_v8  ;;  %627 = vmatprep.subr.bf16.mxu1 %v671_v17  ;;  %v673_v19 = vld [vmem:[%s837_s2 + $0x10] sm:$0xff]   ;;  %v674_v20 = vld [vmem:[%s837_s2 + $0x18] sm:$0xff]   ;;  %v53_v22 = vld [vmem:[#allocation2] sm:$0xff]  ;;  %s700_s2 = smov [#allocation3]  }
  0x19   :  { %628 = vmatpush3.bf16.msra.mxu1 %v671_v17  ;;  %v55_v21 = vld [vmem:[#allocation2 + $0x10] sm:$0xff]  ;;  %v56_v24 = vld [vmem:[#allocation2 + $0x18] sm:$0xff]  ;;  %v54_v27 = vld [vmem:[#allocation2 + $0x8] sm:$0xff]  ;;  %s528_s23 = sshll.u32 %s700_s2, 4  ;;  %s529_s23 = int_to_ptr.vmem [resolvable:$true] %s528_s23 }
  0x1a   :  { %629 = vmatprep.subr.bf16.mxu1 %v672_v18  ;;  %v59_v33 = vld [vmem:[#allocation2 + $0x30] sm:$0xff]  ;;  %v57_v34 = vld [vmem:[#allocation2 + $0x20] sm:$0xff]  ;;  %v60_v36 = vld [vmem:[#allocation2 + $0x38] sm:$0xff]  ;;  %s675_s24 = scalar_lea.vmem %s529_s23, 2048  ;;  %p680_p1 = scmp.lt.s32.totalorder %s529_s23, %s529_s23 }
  0x1b   :  { %608 = vmatpush3.bf16.msra.mxu0 %v661_v8  ;;  %v58_v39 = vld [vmem:[#allocation2 + $0x28] sm:$0xff]  ;;  %v63_v48 = vld [vmem:[#allocation2 + $0x50] sm:$0xff]  ;;  %v61_v51 = vld [vmem:[#allocation2 + $0x40] sm:$0xff]  ;;  %p676_p0 = scmp.ne.s32.totalorder %s529_s23, %s675_s24  ;;  %p681_p2 = scmp.lt.s32.totalorder %s675_s24, %s675_s24 }
  0x1c   :  { %609 = vmatprep.subr.bf16.mxu0 %v662_v9  ;;  %v64_v54 = vld [vmem:[#allocation2 + $0x58] sm:$0xff]  ;;  %v62_v57 = vld [vmem:[#allocation2 + $0x48] sm:$0xff]  ;;  %v67_v2 = vld [vmem:[#allocation2 + $0x70] sm:$0xff] }
  0x1d   :  { %630 = vmatpush3.bf16.msra.mxu1 %v672_v18  ;;  %v65_v5 = vld [vmem:[#allocation2 + $0x60] sm:$0xff]  ;;  %v68_v8 = vld [vmem:[#allocation2 + $0x78] sm:$0xff]  ;;  %p682_p3 = por %p681_p2, %p680_p1 }
  0x1e   :  { %631 = vmatprep.subr.bf16.mxu1 %v673_v19 }
  0x1f   :  { %610 = vmatpush3.bf16.msra.mxu0 %v662_v9  ;;  %p683_p4 = pnand %p682_p3, %p676_p0 }
  0x21   :  { %632 = vmatpush3.bf16.msra.mxu1 %v673_v19 }
  0x22   :  { %612 = vmatmul.mubr.bf16.vlgmr.msra.gmra.mrb[0].mxu0 %v664_v10  ;;  %633 = vmatprep.subr.bf16.mxu1 %v674_v20 }
  0x23   :  { %615 = vmatprep.mubr.bf16.mxu0 %v665_v11  ;;  %v66_v11 = vld [vmem:[#allocation2 + $0x68] sm:$0xff] }
  0x25   :  { %634 = vmatpush3.bf16.msra.mxu1 %v674_v20 }
  0x2a   :  { %616 = vmatmul.mubr.bf16.gmra.mrb[4].mxu0 %v666_v12 }
  0x2b   :  { %619 = vmatprep.mubr.bf16.mxu0 %v667_v13 }
  0x32   :  { %620 = vmatmul.mubr.bf16.gmra.mrb[8].mxu0 %v668_v14 }
  0x33   :  { %623 = vmatprep.mubr.bf16.mxu0 %v669_v15 }
  0x3a   :  { %624 = vmatmul.mubr.bf16.gmra.mrb[12].mxu0 %v670_v16 }
  0xf5   :  { %v613_v23 = vpop.f32.mrb[0].mxu0 }
  0xf6   :  { %v280_v25 = vadd.f32 %v613_v23, %v55_v21  ;;  %v215_v26 = vpop.f32.mrb[1].mxu0 }
  0xf7   :  { %v278_v28 = vadd.f32 %v215_v26, %v53_v22  ;;  %v614_v29 = vpop.f32.mrb[2].mxu0 }
  0xf8   :  { %297 = vst.msk [vmem:[#allocation2 + $0x10] sm:$0xff] %vm20_vm0, %v280_v25  ;;  %v281_v30 = vadd.f32 %v614_v29, %v56_v24  ;;  %v218_v31 = vpop.f32.mrb[3].mxu0 }
  0xf9   :  { %295 = vst.msk [vmem:[#allocation2] sm:$0xff] %vm20_vm0, %v278_v28  ;;  %v279_v32 = vadd.f32 %v218_v31, %v54_v27 }
  0xfa   :  { %298 = vst.msk [vmem:[#allocation2 + $0x18] sm:$0xff] %vm20_vm0, %v281_v30 }
  0xfb   :  { %296 = vst.msk [vmem:[#allocation2 + $0x8] sm:$0xff] %vm20_vm0, %v279_v32 }
  0xfd   :  { %v617_v35 = vpop.f32.mrb[4].mxu0 }
  0xfe   :  { %v284_v37 = vadd.f32 %v617_v35, %v59_v33  ;;  %v231_v38 = vpop.f32.mrb[5].mxu0 }
  0xff   :  { %v282_v40 = vadd.f32 %v231_v38, %v57_v34  ;;  %v618_v41 = vpop.f32.mrb[6].mxu0  ;;  %v316_v50 = vld [vmem:[#allocation2 + $0x10] sm:$0xff] }
 0x100   :  { %301 = vst.msk [vmem:[#allocation2 + $0x30] sm:$0xff] %vm20_vm0, %v284_v37  ;;  %v285_v42 = vadd.f32 %v618_v41, %v60_v36  ;;  %v234_v43 = vpop.f32.mrb[7].mxu0  ;;  %v314_v46 = vld [vmem:[#allocation2] sm:$0xff] }
 0x101   :  { %299 = vst.msk [vmem:[#allocation2 + $0x20] sm:$0xff] %vm20_vm0, %v282_v40  ;;  %v283_v44 = vadd.f32 %v234_v43, %v58_v39  ;;  %v317_v45 = vld [vmem:[#allocation2 + $0x18] sm:$0xff] }
 0x102   :  { %302 = vst.msk [vmem:[#allocation2 + $0x38] sm:$0xff] %vm20_vm0, %v285_v42  ;;  %v315_v47 = vld [vmem:[#allocation2 + $0x8] sm:$0xff]  ;;  %v331_v52 = vpack.c.bf16 %v317_v45, %v316_v50 }
 0x103   :  { %300 = vst.msk [vmem:[#allocation2 + $0x28] sm:$0xff] %vm20_vm0, %v283_v44  ;;  %v330_v49 = vpack.c.bf16 %v315_v47, %v314_v46 }
 0x105   :  { %v621_v53 = vpop.f32.mrb[8].mxu0  ;;  %635 = vmatprep.mubr.msk.bf16.mxu1 %vm20_vm0, %v330_v49 }
 0x106   :  { %v288_v55 = vadd.f32 %v621_v53, %v63_v48  ;;  %v247_v56 = vpop.f32.mrb[9].mxu0  ;;  %636 = vmatmul.mubr.msk.bf16.vlgmr.msra.gmra.mrb[0].mxu1 %vm20_vm0, %v331_v52 }
 0x107   :  { %v286_v58 = vadd.f32 %v247_v56, %v61_v51  ;;  %v622_v59 = vpop.f32.mrb[10].mxu0  ;;  %v320_v4 = vld [vmem:[#allocation2 + $0x30] sm:$0xff] }
 0x108   :  { %305 = vst.msk [vmem:[#allocation2 + $0x50] sm:$0xff] %vm20_vm0, %v288_v55  ;;  %v289_v60 = vadd.f32 %v622_v59, %v64_v54  ;;  %v250_v61 = vpop.f32.mrb[11].mxu0  ;;  %v318_v0 = vld [vmem:[#allocation2 + $0x20] sm:$0xff] }
 0x109   :  { %303 = vst.msk [vmem:[#allocation2 + $0x40] sm:$0xff] %vm20_vm0, %v286_v58  ;;  %v287_v62 = vadd.f32 %v250_v61, %v62_v57  ;;  %v321_v63 = vld [vmem:[#allocation2 + $0x38] sm:$0xff] }
 0x10a   :  { %306 = vst.msk [vmem:[#allocation2 + $0x58] sm:$0xff] %vm20_vm0, %v289_v60  ;;  %v319_v1 = vld [vmem:[#allocation2 + $0x28] sm:$0xff]  ;;  %v333_v6 = vpack.c.bf16 %v321_v63, %v320_v4 }
 0x10b   :  { %304 = vst.msk [vmem:[#allocation2 + $0x48] sm:$0xff] %vm20_vm0, %v287_v62  ;;  %v332_v3 = vpack.c.bf16 %v319_v1, %v318_v0 }
 0x10d   :  { %v625_v7 = vpop.f32.mrb[12].mxu0  ;;  %639 = vmatprep.mubr.msk.bf16.mxu1 %vm20_vm0, %v332_v3 }
 0x10e   :  { %v292_v9 = vadd.f32 %v625_v7, %v67_v2  ;;  %v263_v10 = vpop.f32.mrb[13].mxu0  ;;  %640 = vmatmul.mubr.msk.bf16.gmra.mrb[4].mxu1 %vm20_vm0, %v333_v6 }
 0x10f   :  { %v290_v12 = vadd.f32 %v263_v10, %v65_v5  ;;  %v626_v13 = vpop.f32.mrb[14].mxu0  ;;  %v324_v21 = vld [vmem:[#allocation2 + $0x50] sm:$0xff] }
 0x110   :  { %309 = vst.msk [vmem:[#allocation2 + $0x70] sm:$0xff] %vm20_vm0, %v292_v9  ;;  %v293_v14 = vadd.f32 %v626_v13, %v68_v8  ;;  %v266_v15 = vpop.f32.mrb[15].mxu0  ;;  %v322_v18 = vld [vmem:[#allocation2 + $0x40] sm:$0xff] }
 0x111   :  { %307 = vst.msk [vmem:[#allocation2 + $0x60] sm:$0xff] %vm20_vm0, %v290_v12  ;;  %v291_v16 = vadd.f32 %v266_v15, %v66_v11  ;;  %v325_v17 = vld [vmem:[#allocation2 + $0x58] sm:$0xff] }
 0x112   :  { %310 = vst.msk [vmem:[#allocation2 + $0x78] sm:$0xff] %vm20_vm0, %v293_v14  ;;  %v323_v19 = vld [vmem:[#allocation2 + $0x48] sm:$0xff]  ;;  %v335_v22 = vpack.c.bf16 %v325_v17, %v324_v21 }
 0x113   :  { %308 = vst.msk [vmem:[#allocation2 + $0x68] sm:$0xff] %vm20_vm0, %v291_v16  ;;  %v334_v20 = vpack.c.bf16 %v323_v19, %v322_v18 }
 0x115   :  { %643 = vmatprep.mubr.msk.bf16.mxu1 %vm20_vm0, %v334_v20 }
 0x116   :  { %644 = vmatmul.mubr.msk.bf16.gmra.mrb[8].mxu1 %vm20_vm0, %v335_v22 }
 0x117   :  { %v328_v27 = vld [vmem:[#allocation2 + $0x70] sm:$0xff] }
 0x118   :  { %v326_v24 = vld [vmem:[#allocation2 + $0x60] sm:$0xff] }
 0x119   :  { %v329_v23 = vld [vmem:[#allocation2 + $0x78] sm:$0xff] }
 0x11a   :  { %v327_v25 = vld [vmem:[#allocation2 + $0x68] sm:$0xff]  ;;  %v337_v28 = vpack.c.bf16 %v329_v23, %v328_v27 }
 0x11b   :  { %v336_v26 = vpack.c.bf16 %v327_v25, %v326_v24 }
 0x11d   :  { %647 = vmatprep.mubr.msk.bf16.mxu1 %vm20_vm0, %v336_v26 }
 0x11e   :  { %648 = vmatmul.mubr.msk.bf16.gmra.mrb[12].mxu1 %vm20_vm0, %v337_v28 }
 0x1d9   :  { %v637_v29 = vpop.f32.mrb[0].mxu1 }
 0x1da   :  { %v493_v30 = vmax.f32 %v637_v29, 0.0  ;;  %v428_v31 = vpop.f32.mrb[1].mxu1 }
 0x1db   :  { %v491_v32 = vmax.f32 %v428_v31, 0.0  ;;  %v638_v33 = vpop.f32.mrb[2].mxu1 }
 0x1dc   :  { %509 = vst [vmem:[#allocation3 + $0x10] sm:$0xff] %v493_v30  ;;  %v494_v34 = vmax.f32 %v638_v33, 0.0  ;;  %v431_v35 = vpop.f32.mrb[3].mxu1 }
 0x1dd   :  { %507 = vst [vmem:[#allocation3] sm:$0xff] %v491_v32  ;;  %v492_v36 = vmax.f32 %v431_v35, 0.0 }
 0x1de   :  { %510 = vst [vmem:[#allocation3 + $0x18] sm:$0xff] %v494_v34 }
 0x1df   :  { %508 = vst [vmem:[#allocation3 + $0x8] sm:$0xff] %v492_v36 }
 0x1e1   :  { %v641_v37 = vpop.f32.mrb[4].mxu1 }
 0x1e2   :  { %v497_v38 = vmax.f32 %v641_v37, 0.0  ;;  %v444_v39 = vpop.f32.mrb[5].mxu1 }
 0x1e3   :  { %v495_v40 = vmax.f32 %v444_v39, 0.0  ;;  %v642_v41 = vpop.f32.mrb[6].mxu1 }
 0x1e4   :  { %513 = vst [vmem:[#allocation3 + $0x30] sm:$0xff] %v497_v38  ;;  %v498_v42 = vmax.f32 %v642_v41, 0.0  ;;  %v447_v43 = vpop.f32.mrb[7].mxu1 }
 0x1e5   :  { %511 = vst [vmem:[#allocation3 + $0x20] sm:$0xff] %v495_v40  ;;  %v496_v44 = vmax.f32 %v447_v43, 0.0 }
 0x1e6   :  { %514 = vst [vmem:[#allocation3 + $0x38] sm:$0xff] %v498_v42 }
 0x1e7   :  { %512 = vst [vmem:[#allocation3 + $0x28] sm:$0xff] %v496_v44 }
 0x1e9   :  { %v645_v45 = vpop.f32.mrb[8].mxu1 }
 0x1ea   :  { %v501_v46 = vmax.f32 %v645_v45, 0.0  ;;  %v460_v47 = vpop.f32.mrb[9].mxu1 }
 0x1eb   :  { %v499_v48 = vmax.f32 %v460_v47, 0.0  ;;  %v646_v49 = vpop.f32.mrb[10].mxu1 }
 0x1ec   :  { %517 = vst [vmem:[#allocation3 + $0x50] sm:$0xff] %v501_v46  ;;  %v502_v50 = vmax.f32 %v646_v49, 0.0  ;;  %v463_v51 = vpop.f32.mrb[11].mxu1 }
 0x1ed   :  { %515 = vst [vmem:[#allocation3 + $0x40] sm:$0xff] %v499_v48  ;;  %v500_v52 = vmax.f32 %v463_v51, 0.0 }
 0x1ee   :  { %518 = vst [vmem:[#allocation3 + $0x58] sm:$0xff] %v502_v50 }
 0x1ef   :  { %516 = vst [vmem:[#allocation3 + $0x48] sm:$0xff] %v500_v52 }
 0x1f1   :  { %v649_v53 = vpop.f32.mrb[12].mxu1 }
 0x1f2   :  { %v505_v54 = vmax.f32 %v649_v53, 0.0  ;;  %v476_v55 = vpop.f32.mrb[13].mxu1 }
 0x1f3   :  { %v503_v56 = vmax.f32 %v476_v55, 0.0  ;;  %v650_v57 = vpop.f32.mrb[14].mxu1 }
 0x1f4   :  { %521 = vst [vmem:[#allocation3 + $0x70] sm:$0xff] %v505_v54  ;;  %v506_v58 = vmax.f32 %v650_v57, 0.0  ;;  %v479_v59 = vpop.f32.mrb[15].mxu1 }
 0x1f5   :  { %519 = vst [vmem:[#allocation3 + $0x60] sm:$0xff] %v503_v56  ;;  %v504_v60 = vmax.f32 %v479_v59, 0.0 }
 0x1f6   :  { %522 = vst [vmem:[#allocation3 + $0x78] sm:$0xff] %v506_v58 }
 0x1f7   :  { %520 = vst [vmem:[#allocation3 + $0x68] sm:$0xff] %v504_v60 }
 0x1f8   :  { %686 = shalt.err (!%p683_p4)
}
 0x1f9   :  { %s687_s27 = scalar_lea.hbm %s838_s3, 2048 }
 0x1fa   :  { %p688_p5 = scmp.ne.s32.totalorder %s838_s3, %s687_s27  ;;  %p691_p6 = scmp.lt.u32.totalorder %s687_s27, %s838_s3 }
 0x1fc   :  { %p693_p7 = pnand %p691_p6, %p688_p5 }
 0x1fe   :  { %696 = shalt.err (!%p693_p7)
}
 0x1ff   :  { %s701_s5 = smov 128   ;;  %s702_s6 = smov 8  }
 0x200   :  { %534 = dma.vmem_to_hbm [thread:$0]  %s529_s23, 2048, %s838_s3, [#allocation4], %s701_s5, %s701_s5, %s702_s6  }
 0x201   :  { %697 = dma.done.wait [#allocation4], 2048  }
 0x202   :  { %698 = vsyncadd [#allocation4], 4294965248 }
 0x203   :  { %538 = vsyncpa [#allocation4], 1 }

</bundles_post_ra>
